<compile_context>
chip_gen: v6e
topology: v6e:2x2x1
jax: 0.10.0
libtpu: 0.0.40
codegen_flags: <defaults>
</compile_context>

<pallas_src>
import functools

import jax
import jax.numpy as jnp
from jax.experimental import pallas as pl
from jax.experimental.pallas import tpu as pltpu


def _cdiv(a: int, b: int) -> int:
    return -(-a // b)


def _round_up(x: int, m: int) -> int:
    return ((x + m - 1) // m) * m


def _pad2d(a, rows: int, cols: int):
    pr = rows - a.shape[0]
    pc = cols - a.shape[1]
    if pr == 0 and pc == 0:
        return a
    return jnp.pad(a, ((0, pr), (0, pc)))


def _vmem_capacity_bytes() -> int:
    """Physical VMEM of the current TPU generation (fallback: v7x's 64 MiB)."""
    try:
        return int(pltpu.get_tpu_info().vmem_capacity_bytes)
    except Exception:
        return 64 * 1024 * 1024


def _pick_tm(B: int, block_m: int) -> int:
    """Sublane-aligned batch tile.

    Prefers large MXU-friendly tiles (up to block_m), but (a) keeps >= 2 batch
    tiles when B >= 256 so v7x's second TensorCore gets work, and (b) bounds
    batch-padding waste to ~12.5% of B.
    """
    b8 = _round_up(B, 8)
    if b8 <= 128:
        return b8
    cands = [t for t in (512, 384, 256, 128) if t <= block_m]
    if not cands:
        cands = [_round_up(min(block_m, b8), 8)]
    for tm in cands:
        b_p = _round_up(B, tm)
        if b_p - B > max(B // 8, 8):          # too much padded (wasted) work
            continue
        if B >= 256 and b_p // tm < 2:        # leave work for the 2nd TC (v7x)
            continue
        return tm
    # Fallback: minimize padding with a small sublane-aligned tile.
    n_tiles = max(2 if B >= 256 else 1, _cdiv(B, 128))
    return _round_up(_cdiv(B, n_tiles), 8)


def _pipeline_footprint(In_p, TH, Out_p, TM, itemsize, out_itemsize) -> int:
    """VMEM bytes for the double-buffered pipeline + scratch (with margin)."""
    return (2 * TM * In_p * itemsize          # x blocks (double-buffered)
            + 2 * In_p * TH * itemsize        # w1 blocks
            + 2 * TH * Out_p * itemsize       # w2 blocks
            + 2 * (TH + Out_p) * 4            # bias rows (f32)
            + 2 * TM * Out_p * out_itemsize   # out blocks
            + TM * Out_p * 4                  # f32 accumulator scratch
            + 2 * TM * TH * 4)                # f32 fc1 intermediate (+margin)


def _auto_th(In_p, H_p, Out_p, TM, itemsize, out_itemsize, budget) -> int:
    """Largest multiple-of-128 hidden tile whose pipeline footprint fits."""
    th = H_p
    while th > 128 and _pipeline_footprint(
            In_p, th, Out_p, TM, itemsize, out_itemsize) > budget:
        th = _round_up(th // 2, 128)
    return th


def mlp_kernel(x_ref, w1_ref, b1_ref, w2_ref, b2_ref, o_ref, acc_ref):
    h_idx = pl.program_id(1)

    @pl.when(h_idx == 0)
    def _():
        acc_ref[...] = jnp.zeros_like(acc_ref)

    # fc1 partial: (TM, In_p) @ (In_p, TH) -> f32 accumulate on the MXU.
    hid = jnp.dot(x_ref[...], w1_ref[...], preferred_element_type=jnp.float32)
    # Bias add + ReLU in f32 on the VPU; exact because ReLU is elementwise
    # over the hidden dim, so tiling H is numerically identical.
    hid = jnp.maximum(hid + b1_ref[...], 0.0)
    # fc2 partial: (TM, TH) @ (TH, Out_p), accumulated in f32 across h tiles.
    acc_ref[...] += jnp.dot(hid.astype(w2_ref.dtype), w2_ref[...],
                            preferred_element_type=jnp.float32)

    @pl.when(h_idx == pl.num_programs(1) - 1)
    def _():
        o_ref[...] = (acc_ref[...] + b2_ref[...]).astype(o_ref.dtype)


@functools.partial(jax.jit, static_argnames=("block_m", "block_h", "mxu_dtype"))
def mlp_forward(x, w1, b1, w2, b2, *, block_m=512, block_h=None, mxu_dtype=None):
    """x: (B, In); w1: (In, H); b1: (H,); w2: (H, Out); b2: (Out,).

    mxu_dtype: optional dtype (e.g. jnp.bfloat16) for the dot operands only
    (x, w1, w2).  Recommended on all TPU generations (v5e/v6e/v7x MXUs are
    bf16-native); accumulation and the bias/ReLU epilogue stay f32.
    block_h: optional hidden-dim tile override (rounded to 128); by default it
    is auto-sized from the physical VMEM capacity.
    """
    B, In = x.shape
    H = w1.shape[1]
    Out = w2.shape[1]
    out_dtype = x.dtype
    out_itemsize = jnp.dtype(out_dtype).itemsize

    if mxu_dtype is not None:
        x = x.astype(mxu_dtype)
        w1 = w1.astype(mxu_dtype)
        w2 = w2.astype(mxu_dtype)
    itemsize = jnp.dtype(x.dtype).itemsize

    # --- lane/sublane-align everything -------------------------------------
    In_p = _round_up(In, 128)
    H_p = _round_up(H, 128)
    Out_p = _round_up(Out, 128)              # lane-dense output slab

    TM = _pick_tm(B, block_m)
    B_p = _round_up(B, TM)

    cap = _vmem_capacity_bytes()
    budget = int(cap * 0.85)                  # headroom for compiler internals
    if block_h is not None:
        TH = _round_up(min(block_h, H_p), 128)
    else:
        TH = _auto_th(In_p, H_p, Out_p, TM, itemsize, out_itemsize, budget)
    H_pad = _round_up(H_p, TH)

    x_p = _pad2d(x, B_p, In_p)
    w1_p = _pad2d(w1, In_p, H_pad)
    w2_p = _pad2d(w2, H_pad, Out_p)
    # Biases as lane-dense (1, 128k) f32 rows (padded lanes are zero, so the
    # padded hidden columns stay exactly zero through ReLU and fc2).
    b1_p = _pad2d(b1.reshape(1, H).astype(jnp.float32), 1, H_pad)
    b2_p = _pad2d(b2.reshape(1, Out).astype(jnp.float32), 1, Out_p)

    n_btiles = B_p // TM
    n_htiles = H_pad // TH
    grid = (n_btiles, n_htiles)

    # --- scheduling hints ----------------------------------------------------
    flops = 2 * B_p * (In_p * H_pad + H_pad * Out_p)
    bytes_accessed = (
        x_p.size * itemsize
        + n_btiles * (w1_p.size + w2_p.size) * itemsize
        + n_btiles * (b1_p.size + b2_p.size) * 4
        + B_p * Out_p * out_itemsize
    )
    cost = pl.CostEstimate(flops=flops, transcendentals=0,
                           bytes_accessed=bytes_accessed)

    footprint = _pipeline_footprint(In_p, TH, Out_p, TM, itemsize, out_itemsize)
    vmem_limit = int(min(max(footprint * 1.25, 16 * 1024 * 1024),
                         int(cap * 0.95)))

    out_padded = pl.pallas_call(
        mlp_kernel,
        out_shape=jax.ShapeDtypeStruct((B_p, Out_p), out_dtype),
        grid_spec=pltpu.PrefetchScalarGridSpec(
            num_scalar_prefetch=0,
            grid=grid,
            in_specs=[
                pl.BlockSpec((TM, In_p), lambda i, h: (i, 0)),
                pl.BlockSpec((In_p, TH), lambda i, h: (0, h)),
                pl.BlockSpec((1, TH), lambda i, h: (0, h)),
                pl.BlockSpec((TH, Out_p), lambda i, h: (h, 0)),
                pl.BlockSpec((1, Out_p), lambda i, h: (0, 0)),
            ],
            out_specs=pl.BlockSpec((TM, Out_p), lambda i, h: (i, 0)),
            scratch_shapes=[pltpu.VMEM((TM, Out_p), jnp.float32)],
        ),
        compiler_params=pltpu.CompilerParams(
            dimension_semantics=("parallel", "arbitrary"),
            vmem_limit_bytes=vmem_limit,
        ),
        cost_estimate=cost,
    )(x_p, w1_p, b1_p, w2_p, b2_p)

    # Strip the lane/batch padding.
    return out_padded[:B, :Out]


if __name__ == "__main__":
    # Small shapes consistent with the module's forward pass.
    batch = 8
    input_size = 32
    hidden_size = 64
    output_size = 16

    key = jax.random.PRNGKey(0)
    kx, kw1, kb1, kw2, kb2 = jax.random.split(key, 5)

    x = jax.random.normal(kx, (batch, input_size), dtype=jnp.float32)
    # PyTorch nn.Linear stores weight as (out, in); we keep the transposed
    # (in, out) layout so the kernel computes x @ W + b directly.
    w1 = jax.random.normal(kw1, (input_size, hidden_size), jnp.float32) * 0.1
    b1 = jax.random.normal(kb1, (hidden_size,), jnp.float32) * 0.1
    w2 = jax.random.normal(kw2, (hidden_size, output_size), jnp.float32) * 0.1
    b2 = jax.random.normal(kb2, (output_size,), jnp.float32) * 0.1

    ref = jnp.maximum(x @ w1 + b1, 0.0) @ w2 + b2
    out = mlp_forward(x, w1, b1, w2, b2)
    jax.block_until_ready(out)
    assert out.shape == (batch, output_size)
    assert jnp.allclose(out, ref, atol=1e-5, rtol=1e-5)

    # Multi-tile batch (exercises the "parallel" axis / v7x megacore split)
    # and a forced multi-tile hidden reduction (exercises the accumulator).
    big_b, big_h = 512, 384
    xb = jax.random.normal(kx, (big_b, input_size), dtype=jnp.float32)
    w1b = jax.random.normal(kw1, (input_size, big_h), jnp.float32) * 0.05
    b1b = jax.random.normal(kb1, (big_h,), jnp.float32) * 0.05
    w2b = jax.random.normal(kw2, (big_h, output_size), jnp.float32) * 0.05
    ref_b = jnp.maximum(xb @ w1b + b1b, 0.0) @ w2b + b2

    out_b = mlp_forward(xb, w1b, b1b, w2b, b2, block_h=128)
    jax.block_until_ready(out_b)
    assert out_b.shape == (big_b, output_size)
    assert jnp.allclose(out_b, ref_b, atol=5e-4, rtol=5e-4)

    # Auto-tiled path (TH chosen from the queried VMEM capacity).
    out_auto = mlp_forward(xb, w1b, b1b, w2b, b2)
    jax.block_until_ready(out_auto)
    assert jnp.allclose(out_auto, ref_b, atol=5e-4, rtol=5e-4)

    # bf16 operand path (recommended on v5e/v6e/v7x); accumulation stays f32.
    out_bf16 = mlp_forward(xb, w1b, b1b, w2b, b2, mxu_dtype=jnp.bfloat16)
    jax.block_until_ready(out_bf16)
    assert jnp.allclose(out_bf16, ref_b, atol=5e-2, rtol=5e-2)

    print("KERNEL_OK")
</pallas_src>

<mosaic_0001>
module attributes {stable_mosaic.version = 11 : i64} {
  func.func @mlp_kernel(%arg0: i32, %arg1: i32, %arg2: memref<8x128xf32, #tpu.memory_space<vmem>>, %arg3: memref<128x128xf32, #tpu.memory_space<vmem>>, %arg4: memref<1x128xf32, #tpu.memory_space<vmem>>, %arg5: memref<128x128xf32, #tpu.memory_space<vmem>>, %arg6: memref<1x128xf32, #tpu.memory_space<vmem>>, %arg7: memref<8x128xf32, #tpu.memory_space<vmem>>, %arg8: memref<8x128xf32, #tpu.memory_space<vmem>>) attributes {dimension_semantics = [#tpu.dimension_semantics<parallel>, #tpu.dimension_semantics<arbitrary>], iteration_bounds = array<i64: 1, 1>, scalar_prefetch = 0 : i64, scratch_operands = 1 : i64, tpu.core_type = #tpu.core_type<tc>, window_params = [{transform_indices = @transform_0, window_bounds = array<i64: 8, 128>}, {transform_indices = @transform_1, window_bounds = array<i64: 128, 128>}, {transform_indices = @transform_2, window_bounds = array<i64: 1, 128>}, {transform_indices = @transform_3, window_bounds = array<i64: 128, 128>}, {pipeline_mode = #tpu.pipeline_mode<synchronous>, transform_indices = @transform_4, window_bounds = array<i64: 1, 128>}, {transform_indices = @transform_5, window_bounds = array<i64: 8, 128>}]} {
    %c0_i32 = arith.constant 0 : i32
    %0 = arith.cmpi eq, %arg1, %c0_i32 : i32
    %1 = arith.extui %0 : i1 to i32
    %c0_i32_0 = arith.constant 0 : i32
    %2 = arith.cmpi ne, %1, %c0_i32_0 : i32
    scf.if %2 {
      %cst_16 = arith.constant 0.000000e+00 : f32
      %19 = vector.broadcast %cst_16 : f32 to vector<8x128xf32>
      %c0_17 = arith.constant 0 : index
      %c0_18 = arith.constant 0 : index
      %20 = vector.load %arg8[%c0_17, %c0_18] : memref<8x128xf32, #tpu.memory_space<vmem>>, vector<8x128xf32>
      tpu.vector_store %arg8[%c0_17, %c0_18], %19 {strides = array<i32>} : memref<8x128xf32, #tpu.memory_space<vmem>>, vector<8x128xf32>,
    } else {
    }
    %c0 = arith.constant 0 : index
    %c0_1 = arith.constant 0 : index
    %3 = vector.load %arg2[%c0, %c0_1] : memref<8x128xf32, #tpu.memory_space<vmem>>, vector<8x128xf32>
    %c0_2 = arith.constant 0 : index
    %c0_3 = arith.constant 0 : index
    %4 = vector.load %arg3[%c0_2, %c0_3] : memref<128x128xf32, #tpu.memory_space<vmem>>, vector<128x128xf32>
    %cst = arith.constant dense<0.000000e+00> : vector<8x128xf32>
    %5 = tpu.matmul %3, %4, %cst {dimension_numbers = #tpu.dot_dimension_numbers<[1], [0], [0], [1], [0, 0, 1, 1], [], []>} : vector<8x128xf32>, vector<128x128xf32>, vector<8x128xf32> -> vector<8x128xf32>
    %c0_4 = arith.constant 0 : index
    %c0_5 = arith.constant 0 : index
    %6 = vector.load %arg4[%c0_4, %c0_5] : memref<1x128xf32, #tpu.memory_space<vmem>>, vector<1x128xf32>
    %7 = vector.broadcast %6 : vector<1x128xf32> to vector<8x128xf32>
    %8 = arith.addf %5, %7 : vector<8x128xf32>
    %cst_6 = arith.constant 0.000000e+00 : f32
    %9 = vector.broadcast %cst_6 : f32 to vector<8x128xf32>
    %10 = arith.maximumf %8, %9 : vector<8x128xf32>
    %c0_7 = arith.constant 0 : index
    %c0_8 = arith.constant 0 : index
    %11 = vector.load %arg8[%c0_7, %c0_8] : memref<8x128xf32, #tpu.memory_space<vmem>>, vector<8x128xf32>
    %c0_9 = arith.constant 0 : index
    %c0_10 = arith.constant 0 : index
    %12 = vector.load %arg5[%c0_9, %c0_10] : memref<128x128xf32, #tpu.memory_space<vmem>>, vector<128x128xf32>
    %cst_11 = arith.constant dense<0.000000e+00> : vector<8x128xf32>
    %13 = tpu.matmul %10, %12, %cst_11 {dimension_numbers = #tpu.dot_dimension_numbers<[1], [0], [0], [1], [0, 0, 1, 1], [], []>} : vector<8x128xf32>, vector<128x128xf32>, vector<8x128xf32> -> vector<8x128xf32>
    %14 = arith.addf %11, %13 : vector<8x128xf32>
    %c0_12 = arith.constant 0 : index
    %c0_13 = arith.constant 0 : index
    %15 = vector.load %arg8[%c0_12, %c0_13] : memref<8x128xf32, #tpu.memory_space<vmem>>, vector<8x128xf32>
    tpu.vector_store %arg8[%c0_12, %c0_13], %14 {strides = array<i32>} : memref<8x128xf32, #tpu.memory_space<vmem>>, vector<8x128xf32>,
    %c0_i32_14 = arith.constant 0 : i32
    %16 = arith.cmpi eq, %arg1, %c0_i32_14 : i32
    %17 = arith.extui %16 : i1 to i32
    %c0_i32_15 = arith.constant 0 : i32
    %18 = arith.cmpi ne, %17, %c0_i32_15 : i32
    scf.if %18 {
      %c0_16 = arith.constant 0 : index
      %c0_17 = arith.constant 0 : index
      %19 = vector.load %arg8[%c0_16, %c0_17] : memref<8x128xf32, #tpu.memory_space<vmem>>, vector<8x128xf32>
      %c0_18 = arith.constant 0 : index
      %c0_19 = arith.constant 0 : index
      %20 = vector.load %arg6[%c0_18, %c0_19] : memref<1x128xf32, #tpu.memory_space<vmem>>, vector<1x128xf32>
      %21 = vector.broadcast %20 : vector<1x128xf32> to vector<8x128xf32>
      %22 = arith.addf %19, %21 : vector<8x128xf32>
      %c0_20 = arith.constant 0 : index
      %c0_21 = arith.constant 0 : index
      %23 = vector.load %arg7[%c0_20, %c0_21] : memref<8x128xf32, #tpu.memory_space<vmem>>, vector<8x128xf32>
      tpu.vector_store %arg7[%c0_20, %c0_21], %22 {strides = array<i32>} : memref<8x128xf32, #tpu.memory_space<vmem>>, vector<8x128xf32>,
    } else {
    }
    return
  }
  func.func @transform_0(%arg0: i32, %arg1: i32) -> (i32, i32) {
    %c0_i32 = arith.constant 0 : i32
    %c0_i32_0 = arith.constant 0 : i32
    return %arg0, %c0_i32 : i32, i32
  }
  func.func @transform_1(%arg0: i32, %arg1: i32) -> (i32, i32) {
    %c0_i32 = arith.constant 0 : i32
    %c0_i32_0 = arith.constant 0 : i32
    return %c0_i32, %arg1 : i32, i32
  }
  func.func @transform_2(%arg0: i32, %arg1: i32) -> (i32, i32) {
    %c0_i32 = arith.constant 0 : i32
    %c0_i32_0 = arith.constant 0 : i32
    return %c0_i32, %arg1 : i32, i32
  }
  func.func @transform_3(%arg0: i32, %arg1: i32) -> (i32, i32) {
    %c0_i32 = arith.constant 0 : i32
    %c0_i32_0 = arith.constant 0 : i32
    return %arg1, %c0_i32 : i32, i32
  }
  func.func @transform_4(%arg0: i32, %arg1: i32) -> (i32, i32) {
    %c0_i32 = arith.constant 0 : i32
    %c0_i32_0 = arith.constant 0 : i32
    %c0_i32_1 = arith.constant 0 : i32
    return %c0_i32, %c0_i32_0 : i32, i32
  }
  func.func @transform_5(%arg0: i32, %arg1: i32) -> (i32, i32) {
    %c0_i32 = arith.constant 0 : i32
    %c0_i32_0 = arith.constant 0 : i32
    return %arg0, %c0_i32 : i32, i32
  }
}

</mosaic_0001>

<bundles_post_ra>
// kernel: mlp_forward.1
= control target key start
LH: loop header
LB: loop body
LE: loop exit
PB: predicated region body
PF: predicated region fallthrough
CT: control target
= control target key end

     0   :  { %v368_v1 = vmov 0.0   ;;  %vm369_vm0 = vmmov 0   ;;  %s543_s0 = inlined_call_operand.vmem [shape: f32[8,128], index: 0, kind: input, shape index: {}]   ;;  %s544_s1 = inlined_call_operand.vmem [shape: f32[128,128], index: 1, kind: input, shape index: {}]   ;;  %s545_s2 = inlined_call_operand.vmem [shape: f32[1,128], index: 2, kind: input, shape index: {}]   ;;  %s546_s3 = inlined_call_operand.vmem [shape: f32[128,128], index: 3, kind: input, shape index: {}]   ;;  %s547_s4 = inlined_call_operand.vmem [shape: f32[1,128], index: 4, kind: input, shape index: {}]   ;;  %s548_s5 = inlined_call_operand.hbm [shape: f32[8,128], index: 5, kind: output, shape index: {}]  }
   0x1   :  { %v42_v0 = vld [vmem:[%s544_s1 + $0x78] sm:$0xff]  ;;  %273 = vmatprep.subr.mxu0 %v368_v1  ;;  %v41_v2 = vld [vmem:[%s544_s1 + $0x70] sm:$0xff]  ;;  %305 = vmatprep.mubr.msk.f32.mxu0 %vm369_vm0, %v368_v1  ;;  %v40_v3 = vld [vmem:[%s544_s1 + $0x68] sm:$0xff] }
   0x2   :  { %274 = vmatpush3.msra.mxu0 %v42_v0  ;;  %308 = vmatprep.subr.mxu1 %v368_v1  ;;  %v39_v4 = vld [vmem:[%s544_s1 + $0x60] sm:$0xff]  ;;  %v137_v5 = vld [vmem:[%s546_s3 + $0x78] sm:$0xff]  ;;  %v136_v6 = vld [vmem:[%s546_s3 + $0x70] sm:$0xff] }
   0x3   :  { %275 = vmatprep.subr.mxu0 %v368_v1  ;;  %340 = vmatprep.mubr.msk.f32.mxu1 %vm369_vm0, %v368_v1  ;;  %v38_v7 = vld [vmem:[%s544_s1 + $0x58] sm:$0xff]  ;;  %v135_v8 = vld [vmem:[%s546_s3 + $0x68] sm:$0xff]  ;;  %v37_v9 = vld [vmem:[%s544_s1 + $0x50] sm:$0xff] }
   0x4   :  { %276 = vmatpush3.msra.mxu0 %v41_v2  ;;  %309 = vmatpush3.msra.mxu1 %v137_v5  ;;  %v134_v10 = vld [vmem:[%s546_s3 + $0x60] sm:$0xff] }
   0x5   :  { %277 = vmatprep.subr.mxu0 %v368_v1  ;;  %310 = vmatprep.subr.mxu1 %v368_v1 }
   0x6   :  { %278 = vmatpush3.msra.mxu0 %v40_v3  ;;  %311 = vmatpush3.msra.mxu1 %v136_v6 }
   0x7   :  { %279 = vmatprep.subr.mxu0 %v368_v1  ;;  %312 = vmatprep.subr.mxu1 %v368_v1 }
   0x8   :  { %280 = vmatpush3.msra.mxu0 %v39_v4  ;;  %313 = vmatpush3.msra.mxu1 %v135_v8 }
   0x9   :  { %281 = vmatprep.subr.mxu0 %v368_v1 }
   0xa   :  { %282 = vmatpush3.msra.mxu0 %v38_v7 }
   0xb   :  { %10 = vsyncpa [#allocation4], 0  ;;  %283 = vmatprep.subr.mxu0 %v368_v1  ;;  %v36_v11 = vld [vmem:[%s544_s1 + $0x48] sm:$0xff]  ;;  %314 = vmatprep.subr.mxu1 %v368_v1  ;;  %v133_v12 = vld [vmem:[%s546_s3 + $0x58] sm:$0xff]  ;;  %s370_s11 = smov [#allocation3]  }
   0xc   :  { %284 = vmatpush3.msra.mxu0 %v37_v9  ;;  %315 = vmatpush3.msra.mxu1 %v134_v10  ;;  %v35_v13 = vld [vmem:[%s544_s1 + $0x40] sm:$0xff]  ;;  %v132_v14 = vld [vmem:[%s546_s3 + $0x50] sm:$0xff]  ;;  %v34_v15 = vld [vmem:[%s544_s1 + $0x38] sm:$0xff]  ;;  %s229_s12 = sshll.u32 %s370_s11, 4  ;;  %s230_s12 = int_to_ptr.vmem [resolvable:$true] %s229_s12 }
   0xd   :  { %285 = vmatprep.subr.mxu0 %v368_v1  ;;  %316 = vmatprep.subr.mxu1 %v368_v1  ;;  %v131_v16 = vld [vmem:[%s546_s3 + $0x48] sm:$0xff]  ;;  %v33_v17 = vld [vmem:[%s544_s1 + $0x30] sm:$0xff]  ;;  %v130_v18 = vld [vmem:[%s546_s3 + $0x40] sm:$0xff]  ;;  %p351_p1 = scmp.lt.s32.totalorder %s230_s12, %s230_s12 }
   0xe   :  { %286 = vmatpush3.msra.mxu0 %v36_v11  ;;  %317 = vmatpush3.msra.mxu1 %v133_v12  ;;  %v32_v19 = vld [vmem:[%s544_s1 + $0x28] sm:$0xff]  ;;  %v129_v20 = vld [vmem:[%s546_s3 + $0x38] sm:$0xff]  ;;  %v31_v21 = vld [vmem:[%s544_s1 + $0x20] sm:$0xff] }
   0xf   :  { %287 = vmatprep.subr.mxu0 %v368_v1  ;;  %318 = vmatprep.subr.mxu1 %v368_v1  ;;  %v128_v22 = vld [vmem:[%s546_s3 + $0x30] sm:$0xff]  ;;  %v30_v23 = vld [vmem:[%s544_s1 + $0x18] sm:$0xff]  ;;  %v127_v24 = vld [vmem:[%s546_s3 + $0x28] sm:$0xff] }
  0x10   :  { %288 = vmatpush3.msra.mxu0 %v35_v13  ;;  %319 = vmatpush3.msra.mxu1 %v132_v14  ;;  %v29_v25 = vld [vmem:[%s544_s1 + $0x10] sm:$0xff]  ;;  %v126_v26 = vld [vmem:[%s546_s3 + $0x20] sm:$0xff]  ;;  %v28_v27 = vld [vmem:[%s544_s1 + $0x8] sm:$0xff] }
  0x11   :  { %289 = vmatprep.subr.mxu0 %v368_v1  ;;  %320 = vmatprep.subr.mxu1 %v368_v1  ;;  %v125_v28 = vld [vmem:[%s546_s3 + $0x18] sm:$0xff]  ;;  %v27_v29 = vld [vmem:[%s544_s1] sm:$0xff]  ;;  %v124_v31 = vld [vmem:[%s546_s3 + $0x10] sm:$0xff] }
  0x12   :  { %290 = vmatpush3.msra.mxu0 %v34_v15  ;;  %321 = vmatpush3.msra.mxu1 %v131_v16  ;;  %v26_v30 = vld [vmem:[%s543_s0] sm:$0xff]  ;;  %v123_v32 = vld [vmem:[%s546_s3 + $0x8] sm:$0xff] }
  0x13   :  { %291 = vmatprep.subr.mxu0 %v368_v1  ;;  %322 = vmatprep.subr.mxu1 %v368_v1  ;;  %v122_v33 = vld [vmem:[%s546_s3] sm:$0xff]  ;;  %s346_s3 = scalar_lea.vmem %s230_s12, 128 }
  0x14   :  { %292 = vmatpush3.msra.mxu0 %v33_v17  ;;  %323 = vmatpush3.msra.mxu1 %v130_v18  ;;  %v237_v34 = vld [vmem:[%s545_s2] ss:$0 sm:$0xff]  ;;  %p347_p0 = scmp.ne.s32.totalorder %s230_s12, %s346_s3  ;;  %p352_p2 = scmp.lt.s32.totalorder %s346_s3, %s346_s3 }
  0x15   :  { %293 = vmatprep.subr.mxu0 %v368_v1  ;;  %324 = vmatprep.subr.mxu1 %v368_v1  ;;  %v238_v39 = vld [vmem:[%s547_s4] ss:$0 sm:$0xff] }
  0x16   :  { %294 = vmatpush3.msra.mxu0 %v32_v19  ;;  %325 = vmatpush3.msra.mxu1 %v129_v20  ;;  %p353_p3 = por %p352_p2, %p351_p1 }
  0x17   :  { %295 = vmatprep.subr.mxu0 %v368_v1  ;;  %326 = vmatprep.subr.mxu1 %v368_v1 }
  0x18   :  { %296 = vmatpush3.msra.mxu0 %v31_v21  ;;  %327 = vmatpush3.msra.mxu1 %v128_v22  ;;  %p354_p4 = pnand %p353_p3, %p347_p0 }
  0x19   :  { %297 = vmatprep.subr.mxu0 %v368_v1  ;;  %328 = vmatprep.subr.mxu1 %v368_v1 }
  0x1a   :  { %298 = vmatpush3.msra.mxu0 %v30_v23  ;;  %329 = vmatpush3.msra.mxu1 %v127_v24 }
  0x1b   :  { %299 = vmatprep.subr.mxu0 %v368_v1  ;;  %330 = vmatprep.subr.mxu1 %v368_v1 }
  0x1c   :  { %300 = vmatpush3.msra.mxu0 %v29_v25  ;;  %331 = vmatpush3.msra.mxu1 %v126_v26 }
  0x1d   :  { %301 = vmatprep.subr.mxu0 %v368_v1  ;;  %332 = vmatprep.subr.mxu1 %v368_v1 }
  0x1e   :  { %302 = vmatpush3.msra.mxu0 %v28_v27  ;;  %333 = vmatpush3.msra.mxu1 %v125_v28 }
  0x1f   :  { %303 = vmatprep.subr.mxu0 %v368_v1  ;;  %334 = vmatprep.subr.mxu1 %v368_v1 }
  0x20   :  { %304 = vmatpush3.msra.mxu0 %v27_v29  ;;  %335 = vmatpush3.msra.mxu1 %v124_v31 }
  0x21   :  { %306 = vmatmul.mubr.f32.vlgmr.msra.gmra.mxu0 %v26_v30  ;;  %336 = vmatprep.subr.mxu1 %v368_v1 }
  0x22   :  { %337 = vmatpush3.msra.mxu1 %v123_v32 }
  0x23   :  { %338 = vmatprep.subr.mxu1 %v368_v1 }
  0x24   :  { %339 = vmatpush3.msra.mxu1 %v122_v33 }
  0xe1   :  { %v116_v35 = vpop.f32.mrf.mxu0 }
  0xe2   :  { %v117_v36 = vadd.f32 %v237_v34, %v116_v35 }
  0xe3   :  { %v307_v37 = vpop.f32.mrf.mxu0 }
  0xe4   :  { %v120_v38 = vmax.f32 %v117_v36, 0.0 }
  0xe6   :  { %341 = vmatmul.mubr.f32.vlgmr.msra.gmra.mxu1 %v120_v38 }
 0x1a6   :  { %v204_v40 = vpop.f32.mrf.mxu1 }
 0x1a7   :  { %v221_v41 = vadd.f32 %v238_v39, %v204_v40 }
 0x1a8   :  { %v342_v42 = vpop.f32.mrf.mxu1 }
 0x1a9   :  { %222 = vst [vmem:[#allocation3] sm:$0xff] %v221_v41 }
 0x1aa   :  { %357 = shalt.err (!%p354_p4)
}
 0x1ab   :  { %232 = dma.vmem_to_hbm [thread:$0]  %s230_s12, 128, %s548_s5, [#allocation4]  }
 0x1ac   :  { %366 = dma.done.wait [#allocation4], 128  }
 0x1ad   :  { %367 = vsyncadd [#allocation4], 4294967168 }
 0x1ae   :  { %236 = vsyncpa [#allocation4], 1 }

</bundles_post_ra>
